<compile_context>
chip_gen: v5e
topology: v5e:2x2
jax: 0.10.0
libtpu: 0.0.40
codegen_flags: <defaults>
</compile_context>

<pallas_src>
import math

import jax
import jax.numpy as jnp
from jax.experimental import pallas as pl
from jax.experimental.pallas import tpu as pltpu


def _round_up(x, m):
    return ((x + m - 1) // m) * m


# ---------------------------------------------------------------------------
# Kernels
# ---------------------------------------------------------------------------
def _linear_fullk_kernel(x_ref, w_ref, b_ref, o_ref):
    # Whole (padded) reduction in one shot: y = x @ w + b.
    acc = jnp.dot(x_ref[...], w_ref[...], preferred_element_type=jnp.float32)
    o_ref[...] = (acc + b_ref[...].astype(jnp.float32)).astype(o_ref.dtype)


def _linear_ktiled_f32_kernel(x_ref, w_ref, b_ref, o_ref):
    # f32 output: the output block is resident across the K axis, accumulate
    # directly into it (no scratch, no finalize copy).
    @pl.when(pl.program_id(2) == 0)
    def _():
        o_ref[...] = jnp.broadcast_to(b_ref[...], o_ref.shape).astype(o_ref.dtype)

    o_ref[...] += jnp.dot(x_ref[...], w_ref[...], preferred_element_type=jnp.float32)


def _linear_ktiled_scratch_kernel(x_ref, w_ref, b_ref, o_ref, acc_ref):
    # Low-precision output: accumulate in an f32 VMEM scratch, cast on the
    # last K step.
    @pl.when(pl.program_id(2) == 0)
    def _():
        acc_ref[...] = jnp.broadcast_to(b_ref[...], acc_ref.shape).astype(jnp.float32)

    acc_ref[...] += jnp.dot(x_ref[...], w_ref[...], preferred_element_type=jnp.float32)

    @pl.when(pl.program_id(2) == pl.num_programs(2) - 1)
    def _():
        o_ref[...] = acc_ref[...].astype(o_ref.dtype)


# ---------------------------------------------------------------------------
# Wrapper
# ---------------------------------------------------------------------------
_VMEM_WORKSET_BUDGET = 48 * 1024 * 1024   # v7x-safe (64 MiB physical) w/ headroom
_VMEM_LIMIT_BYTES = 56 * 1024 * 1024


def linear_pallas(x, weight, bias, *, vmem_workset_budget=_VMEM_WORKSET_BUDGET):
    """Equivalent of torch.nn.Linear(input_size, output_size)(x).

    x:      (B, input_size)
    weight: (output_size, input_size)  -- PyTorch convention
    bias:   (output_size,)
    """
    B, in_f = x.shape
    out_f = weight.shape[0]
    out_dtype = x.dtype
    itemsize = jnp.dtype(out_dtype).itemsize

    # One-time layout change (amortized at param-load / constant-folded under jit).
    w_t = jnp.transpose(weight)            # (in_f, out_f)
    b2 = bias.reshape(1, out_f)

    # ---- tile selection ---------------------------------------------------
    # tm: cover the whole batch when it is small -> weight streamed once.
    tm = _round_up(B, 8) if B <= 256 else 256
    # tn: lane-dense output tile (multiple of 128).
    tn = _round_up(out_f, 128) if out_f <= 512 else 256

    # Expose >= 2 parallel output tiles when the batch fits one tile
    # (keeps both TensorCores busy on v7x; harmless elsewhere).
    if B <= tm and _round_up(out_f, 128) <= tn and tn > 128:
        tn = _round_up(max(128, _round_up(out_f, 128) // 2), 128)

    # tk: collapse the full reduction if the double-buffered working set fits.
    kp_full = _round_up(in_f, 128)
    full_k_bytes = (2 * (tm + tn) * kp_full + 2 * tm * tn + 2 * tn) * 4
    if full_k_bytes <= vmem_workset_budget:
        tk = kp_full
    else:
        tk = 512
        while ((2 * (tm + tn) * tk + 2 * tm * tn + 2 * tn) * 4 > vmem_workset_budget
               and tn > 128):
            tn = max(128, ((tn // 2) // 128) * 128)

    # ---- zero-pad to tile multiples (keeps the pipelined path for ragged
    #      shapes instead of a giant single-block VMEM footgun) --------------
    Bp = _round_up(B, tm)
    Np = _round_up(out_f, tn)
    Kp = _round_up(in_f, tk)

    xp = x if (Bp == B and Kp == in_f) else jnp.pad(x, ((0, Bp - B), (0, Kp - in_f)))
    wp = w_t if (Kp == in_f and Np == out_f) else jnp.pad(
        w_t, ((0, Kp - in_f), (0, Np - out_f)))
    bp = b2 if Np == out_f else jnp.pad(b2, ((0, 0), (0, Np - out_f)))

    gm, gn, gk = Bp // tm, Np // tn, Kp // tk

    cost = pl.CostEstimate(
        flops=2 * Bp * Kp * Np,
        transcendentals=0,
        bytes_accessed=(xp.size + wp.size + bp.size + Bp * Np) * itemsize,
    )

    if gk == 1:
        # 2-D grid, whole reduction per step: no accumulator, no init/finalize.
        out = pl.pallas_call(
            _linear_fullk_kernel,
            out_shape=jax.ShapeDtypeStruct((Bp, Np), out_dtype),
            grid_spec=pltpu.PrefetchScalarGridSpec(
                num_scalar_prefetch=0,
                grid=(gm, gn),
                in_specs=[
                    pl.BlockSpec((tm, Kp), lambda i, j: (i, 0)),   # x tile
                    pl.BlockSpec((Kp, tn), lambda i, j: (0, j)),   # weight (K, N) tile
                    pl.BlockSpec((1, tn), lambda i, j: (0, j)),    # bias tile
                ],
                out_specs=pl.BlockSpec((tm, tn), lambda i, j: (i, j)),
            ),
            compiler_params=pltpu.CompilerParams(
                dimension_semantics=("parallel", "parallel"),
                vmem_limit_bytes=_VMEM_LIMIT_BYTES,
            ),
            cost_estimate=cost,
        )(xp, wp, bp)
    else:
        # 3-D grid with K innermost (reduction).  f32 outputs accumulate
        # directly into the resident output block; others use an f32 scratch.
        if jnp.dtype(out_dtype) == jnp.float32:
            kernel = _linear_ktiled_f32_kernel
            scratch_shapes = []
        else:
            kernel = _linear_ktiled_scratch_kernel
            scratch_shapes = [pltpu.VMEM((tm, tn), jnp.float32)]
        out = pl.pallas_call(
            kernel,
            out_shape=jax.ShapeDtypeStruct((Bp, Np), out_dtype),
            grid_spec=pltpu.PrefetchScalarGridSpec(
                num_scalar_prefetch=0,
                grid=(gm, gn, gk),
                in_specs=[
                    pl.BlockSpec((tm, tk), lambda i, j, k: (i, k)),   # x tile
                    pl.BlockSpec((tk, tn), lambda i, j, k: (k, j)),   # weight tile
                    pl.BlockSpec((1, tn), lambda i, j, k: (0, j)),    # bias tile
                ],
                out_specs=pl.BlockSpec((tm, tn), lambda i, j, k: (i, j)),
                scratch_shapes=scratch_shapes,
            ),
            compiler_params=pltpu.CompilerParams(
                dimension_semantics=("parallel", "parallel", "arbitrary"),
                vmem_limit_bytes=_VMEM_LIMIT_BYTES,
            ),
            cost_estimate=cost,
        )(xp, wp, bp)

    if Bp != B or Np != out_f:
        out = out[:B, :out_f]
    return out


# ---------------------------------------------------------------------------
# Demo / correctness check
# ---------------------------------------------------------------------------
if __name__ == "__main__":
    key = jax.random.PRNGKey(0)

    # --- SimpleModel(input_size=32, output_size=16), batch=8 ---------------
    input_size, output_size, batch = 32, 16, 8
    kx, kw, kb, key = jax.random.split(key, 4)
    bound = 1.0 / math.sqrt(input_size)
    weight = jax.random.uniform(kw, (output_size, input_size),
                                minval=-bound, maxval=bound, dtype=jnp.float32)
    bias = jax.random.uniform(kb, (output_size,),
                              minval=-bound, maxval=bound, dtype=jnp.float32)
    x = jax.random.normal(kx, (batch, input_size), dtype=jnp.float32)

    y = linear_pallas(x, weight, bias)
    jax.block_until_ready(y)
    y_ref = x @ weight.T + bias
    assert y.shape == (batch, output_size)
    assert jnp.allclose(y, y_ref, atol=1e-5), "small-shape mismatch vs reference"

    # --- Ragged shape: exercises padding + pipelined 2-D (full-K) grid -----
    B2, in2, out2 = 100, 200, 130
    kx2, kw2, kb2, key = jax.random.split(key, 4)
    bound2 = 1.0 / math.sqrt(in2)
    weight2 = jax.random.uniform(kw2, (out2, in2),
                                 minval=-bound2, maxval=bound2, dtype=jnp.float32)
    bias2 = jax.random.uniform(kb2, (out2,),
                               minval=-bound2, maxval=bound2, dtype=jnp.float32)
    x2 = jax.random.normal(kx2, (B2, in2), dtype=jnp.float32)

    y2 = linear_pallas(x2, weight2, bias2)
    jax.block_until_ready(y2)
    y2_ref = x2 @ weight2.T + bias2
    assert y2.shape == (B2, out2)
    assert jnp.allclose(y2, y2_ref, atol=1e-4, rtol=1e-4), "ragged-shape mismatch"

    # --- Force the K-tiled (3-D grid) path for coverage ---------------------
    B3, in3, out3 = 64, 1280, 384
    kx3, kw3, kb3, key = jax.random.split(key, 4)
    bound3 = 1.0 / math.sqrt(in3)
    weight3 = jax.random.uniform(kw3, (out3, in3),
                                 minval=-bound3, maxval=bound3, dtype=jnp.float32)
    bias3 = jax.random.uniform(kb3, (out3,),
                               minval=-bound3, maxval=bound3, dtype=jnp.float32)
    x3 = jax.random.normal(kx3, (B3, in3), dtype=jnp.float32)

    y3 = linear_pallas(x3, weight3, bias3, vmem_workset_budget=256 * 1024)
    jax.block_until_ready(y3)
    y3_ref = x3 @ weight3.T + bias3
    assert y3.shape == (B3, out3)
    assert jnp.allclose(y3, y3_ref, atol=1e-3, rtol=1e-3), "K-tiled path mismatch"

    print("KERNEL_OK")
</pallas_src>

<mosaic_0001>
module attributes {stable_mosaic.version = 11 : i64} {
  func.func @_linear_fullk_kernel(%arg0: i32, %arg1: i32, %arg2: memref<8x128xf32, #tpu.memory_space<vmem>>, %arg3: memref<128x128xf32, #tpu.memory_space<vmem>>, %arg4: memref<1x128xf32, #tpu.memory_space<vmem>>, %arg5: memref<8x128xf32, #tpu.memory_space<vmem>>) attributes {dimension_semantics = [#tpu.dimension_semantics<parallel>, #tpu.dimension_semantics<parallel>], iteration_bounds = array<i64: 1, 1>, scalar_prefetch = 0 : i64, scratch_operands = 0 : i64, tpu.core_type = #tpu.core_type<tc>, window_params = [{transform_indices = @transform_0, window_bounds = array<i64: 8, 128>}, {transform_indices = @transform_1, window_bounds = array<i64: 128, 128>}, {transform_indices = @transform_2, window_bounds = array<i64: 1, 128>}, {transform_indices = @transform_3, window_bounds = array<i64: 8, 128>}]} {
    %c0 = arith.constant 0 : index
    %c0_0 = arith.constant 0 : index
    %0 = vector.load %arg2[%c0, %c0_0] : memref<8x128xf32, #tpu.memory_space<vmem>>, vector<8x128xf32>
    %c0_1 = arith.constant 0 : index
    %c0_2 = arith.constant 0 : index
    %1 = vector.load %arg3[%c0_1, %c0_2] : memref<128x128xf32, #tpu.memory_space<vmem>>, vector<128x128xf32>
    %cst = arith.constant dense<0.000000e+00> : vector<8x128xf32>
    %2 = tpu.matmul %0, %1, %cst {dimension_numbers = #tpu.dot_dimension_numbers<[1], [0], [0], [1], [0, 0, 1, 1], [], []>} : vector<8x128xf32>, vector<128x128xf32>, vector<8x128xf32> -> vector<8x128xf32>
    %c0_3 = arith.constant 0 : index
    %c0_4 = arith.constant 0 : index
    %3 = vector.load %arg4[%c0_3, %c0_4] : memref<1x128xf32, #tpu.memory_space<vmem>>, vector<1x128xf32>
    %4 = vector.broadcast %3 : vector<1x128xf32> to vector<8x128xf32>
    %5 = arith.addf %2, %4 : vector<8x128xf32>
    %c0_5 = arith.constant 0 : index
    %c0_6 = arith.constant 0 : index
    %6 = vector.load %arg5[%c0_5, %c0_6] : memref<8x128xf32, #tpu.memory_space<vmem>>, vector<8x128xf32>
    tpu.vector_store %arg5[%c0_5, %c0_6], %5 {strides = array<i32>} : memref<8x128xf32, #tpu.memory_space<vmem>>, vector<8x128xf32>,
    return
  }
  func.func @transform_0(%arg0: i32, %arg1: i32) -> (i32, i32) {
    %c0_i32 = arith.constant 0 : i32
    %c0_i32_0 = arith.constant 0 : i32
    return %arg0, %c0_i32 : i32, i32
  }
  func.func @transform_1(%arg0: i32, %arg1: i32) -> (i32, i32) {
    %c0_i32 = arith.constant 0 : i32
    %c0_i32_0 = arith.constant 0 : i32
    return %c0_i32, %arg1 : i32, i32
  }
  func.func @transform_2(%arg0: i32, %arg1: i32) -> (i32, i32) {
    %c0_i32 = arith.constant 0 : i32
    %c0_i32_0 = arith.constant 0 : i32
    return %c0_i32, %arg1 : i32, i32
  }
  func.func @transform_3(%arg0: i32, %arg1: i32) -> (i32, i32) {
    %c0_i32 = arith.constant 0 : i32
    return %arg0, %arg1 : i32, i32
  }
}

</mosaic_0001>

<bundles_post_ra>
// kernel: tpu_custom_call.1
= control target key start
LH: loop header
LB: loop body
LE: loop exit
PB: predicated region body
PF: predicated region fallthrough
CT: control target
= control target key end

     0   :  { %8 = vsyncpa [#allocation3], 0  ;;  %s226_s0 = inlined_call_operand.hbm [shape: f32[8,128], index: 0, kind: input, shape index: {}]   ;;  %s227_s1 = inlined_call_operand.hbm [shape: f32[128,128], index: 1, kind: input, shape index: {}]   ;;  %s228_s2 = inlined_call_operand.vmem [shape: f32[1,128], index: 2, kind: input, shape index: {}]   ;;  %s229_s3 = inlined_call_operand.hbm [shape: f32[8,128], index: 3, kind: output, shape index: {}]  }
   0x1   :  { %9 = vsyncpa [#allocation6], 0 }
   0x2   :  { %10 = vsyncpa [#allocation4], 0  ;;  %s16_s14 = sshll.u32 %s226_s0, 4  ;;  %s189_s15 = smov [#allocation2]   ;;  %s17_s14 = int_to_ptr.hbm [resolvable:$true] %s16_s14 }
   0x3   :  { %s18_s16 = sshll.u32 %s189_s15, 4  ;;  %s26_s19 = sshll.u32 %s227_s1, 4  ;;  %s19_s16 = int_to_ptr.vmem [resolvable:$true] %s18_s16  ;;  %s27_s19 = int_to_ptr.hbm [resolvable:$true] %s26_s19 }
   0x4   :  { %21 = dma.hbm_to_vmem [thread:$0]  %s17_s14, 128, %s19_s16, [#allocation3]  }
   0x5   :  { %s190_s20 = smov [#allocation5]   ;;  %s191_s22 = smov 128  }
   0x6   :  { %s28_s21 = sshll.u32 %s190_s20, 4  ;;  %s192_s23 = smov 8   ;;  %s29_s21 = int_to_ptr.vmem [resolvable:$true] %s28_s21 }
   0x7   :  { %34 = dma.hbm_to_vmem [thread:$0]  %s27_s19, 2048, %s29_s21, [#allocation6], %s191_s22, %s191_s22, %s192_s23  }
   0x8   :  { %183 = dma.done.wait [#allocation3], 128  }
   0x9   :  { %184 = vsyncadd [#allocation3], 4294967168 }
   0xa   :  { %185 = dma.done.wait [#allocation6], 2048  }
   0xb   :  { %186 = vsyncadd [#allocation6], 4294965248  ;;  %v61_v0 = vld [vmem:[#allocation5 + $0x78] sm:$0xff]  ;;  %v60_v1 = vld [vmem:[#allocation5 + $0x70] sm:$0xff]  ;;  %s193_s24 = smov [#allocation7]   ;;  %s94_s28 = sshll.u32 %s229_s3, 4  ;;  %s95_s28 = int_to_ptr.hbm [resolvable:$true] %s94_s28 }
   0xc   :  { %66 = vmatpush.msra.mxu0 %v61_v0  ;;  %v59_v2 = vld [vmem:[#allocation5 + $0x68] sm:$0xff]  ;;  %v58_v3 = vld [vmem:[#allocation5 + $0x60] sm:$0xff]  ;;  %v57_v4 = vld [vmem:[#allocation5 + $0x58] sm:$0xff]  ;;  %s92_s25 = sshll.u32 %s193_s24, 4  ;;  %s93_s25 = int_to_ptr.vmem [resolvable:$true] %s92_s25 }
   0xd   :  { %v56_v5 = vld [vmem:[#allocation5 + $0x50] sm:$0xff]  ;;  %v55_v6 = vld [vmem:[#allocation5 + $0x48] sm:$0xff]  ;;  %v54_v7 = vld [vmem:[#allocation5 + $0x40] sm:$0xff] }
   0xe   :  { %67 = vmatpush.msra.mxu0 %v60_v1  ;;  %v53_v8 = vld [vmem:[#allocation5 + $0x38] sm:$0xff]  ;;  %v52_v9 = vld [vmem:[#allocation5 + $0x30] sm:$0xff]  ;;  %v51_v10 = vld [vmem:[#allocation5 + $0x28] sm:$0xff] }
   0xf   :  { %v50_v11 = vld [vmem:[#allocation5 + $0x20] sm:$0xff]  ;;  %v49_v12 = vld [vmem:[#allocation5 + $0x18] sm:$0xff]  ;;  %v48_v13 = vld [vmem:[#allocation5 + $0x10] sm:$0xff] }
  0x10   :  { %68 = vmatpush.msra.mxu0 %v59_v2  ;;  %v47_v14 = vld [vmem:[#allocation5 + $0x8] sm:$0xff]  ;;  %v46_v15 = vld [vmem:[#allocation5] sm:$0xff]  ;;  %v45_v16 = vld [vmem:[#allocation2] sm:$0xff] }
  0x11   :  { %v110_v17 = vld [vmem:[%s228_s2] ss:$0 sm:$0xff] }
  0x12   :  { %69 = vmatpush.msra.mxu0 %v58_v3 }
  0x14   :  { %70 = vmatpush.msra.mxu0 %v57_v4 }
  0x16   :  { %71 = vmatpush.msra.mxu0 %v56_v5 }
  0x18   :  { %72 = vmatpush.msra.mxu0 %v55_v6 }
  0x1a   :  { %73 = vmatpush.msra.mxu0 %v54_v7 }
  0x1c   :  { %74 = vmatpush.msra.mxu0 %v53_v8 }
  0x1e   :  { %75 = vmatpush.msra.mxu0 %v52_v9 }
  0x20   :  { %76 = vmatpush.msra.mxu0 %v51_v10 }
  0x22   :  { %77 = vmatpush.msra.mxu0 %v50_v11 }
  0x24   :  { %78 = vmatpush.msra.mxu0 %v49_v12 }
  0x26   :  { %79 = vmatpush.msra.mxu0 %v48_v13 }
  0x28   :  { %80 = vmatpush.msra.mxu0 %v47_v14 }
  0x2a   :  { %81 = vmatpush.msra.mxu0 %v46_v15 }
  0x2b   :  { %82 = vmatmul.f32.vlgmr.msra.gmra.mxu0 %v45_v16 }
  0xa8   :  { %v83_v18 = vpop.f32.mrf.mxu0 }
  0xa9   :  { %v84_v19 = vadd.f32 %v110_v17, %v83_v18 }
  0xab   :  { %86 = vst [vmem:[#allocation7] sm:$0xff] %v84_v19 }
  0xac   :  { %97 = dma.vmem_to_hbm [thread:$0]  %s93_s25, 128, %s95_s28, [#allocation4]  }
  0xad   :  { %187 = dma.done.wait [#allocation4], 128  }
  0xae   :  { %188 = vsyncadd [#allocation4], 4294967168 }
  0xaf   :  { %102 = vsyncpa [#allocation3], 1 }
  0xb0   :  { %103 = vsyncpa [#allocation6], 1 }
  0xb1   :  { %104 = vsyncpa [#allocation4], 1 }

</bundles_post_ra>
